<compile_context>
chip_gen: v5e
topology: v5e:2x2
jax: 0.10.0
libtpu: 0.0.40
codegen_flags: <defaults>
</compile_context>

<pallas_src>
import functools

import jax
import jax.numpy as jnp
import numpy as np
from jax.experimental import pallas as pl
from jax.experimental.pallas import tpu as pltpu

# Keep the reference math (and interpret-mode emulation of the kernel bodies)
# at full f32 matmul precision instead of TPU's bf16-by-default f32 dots.
jax.config.update("jax_default_matmul_precision", "highest")

EPS = 1e-5                          # PyTorch BatchNorm2d default eps


# ----------------------------------------------------------------------------
# Generation-aware tuning
# ----------------------------------------------------------------------------
def _hw_tuning():
    """(vmem_limit_bytes, hw_tile_cap), chosen per TPU generation."""
    vmem = 0
    try:
        get_info = getattr(pltpu, "get_tpu_info", None)
        if get_info is not None:
            vmem = int(getattr(get_info(), "vmem_capacity_bytes", 0) or 0)
    except Exception:
        vmem = 0
    if vmem >= 96 * 1024 * 1024:        # v5e / v6e: 128 MiB physical VMEM
        return 64 * 1024 * 1024, 4096
    return 32 * 1024 * 1024, 2048       # v7x (64 MiB physical) or unknown


def _pick_hw_tile(hw, cap):
    """Largest multiple of 128 that divides hw and is <= cap; else full hw."""
    best = None
    for t in range(128, min(hw, cap) + 1, 128):
        if hw % t == 0:
            best = t
    return best if best is not None else hw


# ----------------------------------------------------------------------------
# BN folding (plain XLA, runs between pallas_calls on tiny (C, 2) totals)
# ----------------------------------------------------------------------------
def _fold_bn(totals, count, gamma, beta):
    """totals: (C, 2) per-channel [sum, sumsq] over N*H*W -> scale/shift."""
    mean = totals[:, 0] / count
    var = jnp.maximum(totals[:, 1] / count - mean * mean, 0.0)   # clamp >= 0
    a = gamma * jax.lax.rsqrt(var + EPS)
    b = beta - mean * a
    return a.reshape(-1, 1), b.reshape(-1, 1)


# ----------------------------------------------------------------------------
# Kernel A: BN(pre-folded) -> ReLU -> single fused 1x1 conv (+ output stats)
# ----------------------------------------------------------------------------
def _make_bn_relu_1x1_kernel(n_src, store_dtype, mxu_dtype):
    def kernel(*refs):
        src_refs = refs[:n_src]
        a_ref, b_ref, w_ref = refs[n_src:n_src + 3]
        mid_ref, mst_ref = refs[n_src + 3], refs[n_src + 4]
        s1_ref, s2_ref = refs[n_src + 5], refs[n_src + 6]
        j = pl.program_id(1)

        # Sublane-concat the sources, apply pre-folded BN scale/shift + ReLU.
        bottom = jnp.concatenate(
            [r[0].astype(jnp.float32) for r in src_refs], axis=0)
        h = jnp.maximum(bottom * a_ref[...] + b_ref[...], 0.0)
        # ONE MXU matmul over the full concatenated K = C_total.
        acc = jnp.dot(w_ref[...], h.astype(mxu_dtype),
                      preferred_element_type=jnp.float32)        # (cpl, hwt)
        mq = acc.astype(store_dtype)
        mid_ref[0] = mq                                          # lane-dense

        # Per-channel [sum, sumsq] of the *stored* mid, accumulated across the
        # spatial-tile axis in VMEM; written once per image on the last tile.
        mf = mq.astype(jnp.float32)
        t1 = jnp.sum(mf, axis=1, keepdims=True)
        t2 = jnp.sum(mf * mf, axis=1, keepdims=True)

        @pl.when(j == 0)
        def _():
            s1_ref[...] = jnp.zeros_like(s1_ref)
            s2_ref[...] = jnp.zeros_like(s2_ref)

        s1_ref[...] += t1
        s2_ref[...] += t2

        @pl.when(j == pl.num_programs(1) - 1)
        def _():
            mst_ref[0, :, 0:1] = s1_ref[...]
            mst_ref[0, :, 1:2] = s2_ref[...]

    return kernel


@functools.lru_cache(maxsize=None)
def _conv1x1_call(src_shapes, src_dtypes, cpl, hwt, store_dtype, mxu_dtype,
                  vmem_limit):
    del src_dtypes  # cache-key only; jit re-specializes on dtypes anyway
    n, _, hw = src_shapes[0]
    tiles = hw // hwt
    c_total = sum(s[1] for s in src_shapes)
    sdt, mdt = jnp.dtype(store_dtype), jnp.dtype(mxu_dtype)
    kernel = _make_bn_relu_1x1_kernel(len(src_shapes), sdt, mdt)
    in_specs = [pl.BlockSpec((1, s[1], hwt), lambda i, j: (i, 0, j))
                for s in src_shapes]
    in_specs += [pl.BlockSpec((c_total, 1), lambda i, j: (0, 0)),
                 pl.BlockSpec((c_total, 1), lambda i, j: (0, 0)),
                 pl.BlockSpec((cpl, c_total), lambda i, j: (0, 0))]
    call = pl.pallas_call(
        kernel,
        grid=(n, tiles),
        in_specs=in_specs,
        out_specs=(pl.BlockSpec((1, cpl, hwt), lambda i, j: (i, 0, j)),
                   pl.BlockSpec((1, cpl, 2), lambda i, j: (i, 0, 0))),
        out_shape=(jax.ShapeDtypeStruct((n, cpl, hw), sdt),
                   jax.ShapeDtypeStruct((n, cpl, 2), jnp.float32)),
        scratch_shapes=[pltpu.VMEM((cpl, 1), jnp.float32),
                        pltpu.VMEM((cpl, 1), jnp.float32)],
        compiler_params=pltpu.CompilerParams(
            dimension_semantics=("parallel", "arbitrary"),
            vmem_limit_bytes=vmem_limit),
    )
    return jax.jit(call)


def bn_relu_conv1x1(sources, a, b, w_cat, cpl, hwt, store_dtype, vmem_limit):
    call = _conv1x1_call(tuple(s.shape for s in sources),
                         tuple(str(s.dtype) for s in sources),
                         cpl, hwt, str(store_dtype), str(w_cat.dtype),
                         int(vmem_limit))
    return call(*sources, a, b, w_cat)


# ----------------------------------------------------------------------------
# Kernel B: BN(pre-folded) -> ReLU -> 3x3 conv (pad=1) in-kernel (+ out stats)
# ----------------------------------------------------------------------------
def _make_bn_relu_conv3x3_kernel(height, width, cpl, store_dtype, mxu_dtype):
    hw = height * width

    def kernel(mid_ref, a_ref, b_ref, w3_ref, mask_ref, out_ref, ost_ref):
        h = jnp.maximum(
            mid_ref[0].astype(jnp.float32) * a_ref[...] + b_ref[...], 0.0)
        # All nine taps in ONE MXU matmul: (9*cpl, cpl) @ (cpl, H*W).
        p_all = jnp.dot(w3_ref[...], h.astype(mxu_dtype),
                        preferred_element_type=jnp.float32)
        acc = p_all[4 * cpl:5 * cpl, :]          # centre tap: no shift / mask
        m = 0
        for kh in range(3):
            for kw in range(3):
                if kh == 1 and kw == 1:
                    continue
                delta = (kh - 1) * width + (kw - 1)
                t = kh * 3 + kw
                # shifted[p] = p_t[p + delta]; out-of-image taps are zeroed by
                # the precomputed boundary mask (== the conv's zero padding).
                rolled = pltpu.roll(p_all[t * cpl:(t + 1) * cpl, :],
                                    (-delta) % hw, 1)
                acc = acc + rolled * mask_ref[m:m + 1, :]
                m += 1
        oq = acc.astype(store_dtype)
        out_ref[0] = oq                                          # lane-dense
        of = oq.astype(jnp.float32)
        ost_ref[0, :, 0:1] = jnp.sum(of, axis=1, keepdims=True)
        ost_ref[0, :, 1:2] = jnp.sum(of * of, axis=1, keepdims=True)

    return kernel


@functools.lru_cache(maxsize=None)
def _conv3x3_call(n, cpl, height, width, store_dtype, mxu_dtype, vmem_limit):
    # TODO(synk): at production H*W (>=3136) tile spatially over rows with a
    # 1-row halo so the (9*cpl, HW) f32 intermediate fits v7x VMEM and both of
    # its TensorCores stay busy for small/odd N.
    hw = height * width
    sdt, mdt = jnp.dtype(store_dtype), jnp.dtype(mxu_dtype)
    kernel = _make_bn_relu_conv3x3_kernel(height, width, cpl, sdt, mdt)
    call = pl.pallas_call(
        kernel,
        grid=(n,),
        in_specs=[pl.BlockSpec((1, cpl, hw), lambda i: (i, 0, 0)),
                  pl.BlockSpec((cpl, 1), lambda i: (0, 0)),
                  pl.BlockSpec((cpl, 1), lambda i: (0, 0)),
                  pl.BlockSpec((9 * cpl, cpl), lambda i: (0, 0)),
                  pl.BlockSpec((8, hw), lambda i: (0, 0))],
        out_specs=(pl.BlockSpec((1, cpl, hw), lambda i: (i, 0, 0)),
                   pl.BlockSpec((1, cpl, 2), lambda i: (i, 0, 0))),
        out_shape=(jax.ShapeDtypeStruct((n, cpl, hw), sdt),
                   jax.ShapeDtypeStruct((n, cpl, 2), jnp.float32)),
        compiler_params=pltpu.CompilerParams(
            dimension_semantics=("parallel",),
            vmem_limit_bytes=vmem_limit),
    )
    return jax.jit(call)


def bn_relu_conv3x3(mid, a, b, w3cat, masks, height, width, store_dtype,
                    vmem_limit):
    n, cpl, _ = mid.shape
    call = _conv3x3_call(n, cpl, height, width, str(store_dtype),
                         str(w3cat.dtype), int(vmem_limit))
    return call(mid, a, b, w3cat, masks)


# ----------------------------------------------------------------------------
# Orchestration (Pallas path)
# ----------------------------------------------------------------------------
def _boundary_masks(height, width):
    """(8, H*W) f32 validity masks for the non-centre 3x3 taps (kh-major)."""
    ys = np.arange(height).reshape(height, 1)
    xs = np.arange(width).reshape(1, width)
    rows = []
    for kh in range(3):
        for kw in range(3):
            if kh == 1 and kw == 1:
                continue
            dy, dx = kh - 1, kw - 1
            valid = ((ys + dy >= 0) & (ys + dy < height) &
                     (xs + dx >= 0) & (xs + dx < width))
            rows.append(valid.astype(np.float32).reshape(-1))
    return jnp.asarray(np.stack(rows, axis=0))


def _clique_step(sources, totals, g1, b1, w_cat, g2, b2, w3cat, masks,
                 cpl, height, width, count, hwt, store_dtype, vmem_limit):
    a1, s1 = _fold_bn(jnp.concatenate(totals, axis=0), count, g1, b1)
    mid, mid_part = bn_relu_conv1x1(sources, a1, s1, w_cat, cpl, hwt,
                                    store_dtype, vmem_limit)
    a2, s2 = _fold_bn(jnp.sum(mid_part, axis=0), count, g2, b2)
    blob, blob_part = bn_relu_conv3x3(mid, a2, s2, w3cat, masks, height,
                                      width, store_dtype, vmem_limit)
    return blob, jnp.sum(blob_part, axis=0)


def clique_block_forward(x_nchw, p, *, use_pallas=True,
                         compute_dtype=jnp.bfloat16, hw_tile_cap=None):
    L, loops, cpl, in_ch = p['layer_num'], p['loop_num'], p['cpl'], p['in_ch']
    n, _, height, width = x_nchw.shape
    hw = height * width
    xf = x_nchw.astype(jnp.float32)
    if not use_pallas:                  # pure-jnp reference of the same math
        return _clique_block_ref(xf, p)

    vmem_limit, default_cap = _hw_tuning()
    hwt = _pick_hw_tile(hw, default_cap if hw_tile_cap is None else hw_tile_cap)
    cdt = jnp.dtype(compute_dtype)      # weight / MXU / blob-storage dtype
    count = float(n * hw)
    masks = _boundary_masks(height, width)

    x = xf.reshape(n, in_ch, hw)        # NCHW -> (N, C, H*W), no transpose
    # Input stats as a plain XLA reduction (no dedicated stats kernel).
    x_tot = jnp.stack([jnp.sum(x, axis=(0, 2)),
                       jnp.sum(x * x, axis=(0, 2))], axis=1)     # (in_ch, 2)

    # Pre-concatenate + pre-cast all 1x1 weights (one (cpl, C_total) slab per
    # clique step) and the tap-grouped 3x3 weights; built once, reused across
    # every stage-II loop pass.
    w_cat_I = {i: jnp.concatenate(
        [p['w_in'][i]] + [p['w_cross'][(j, i)] for j in range(1, i)],
        axis=1).astype(cdt) for i in range(1, L + 1)}
    w_cat_II = {i: jnp.concatenate(
        [p['w_cross'][(j, i)] for j in range(1, L + 1) if j != i],
        axis=1).astype(cdt) for i in range(1, L + 1)}
    # 3x3 OIHW regrouped per tap: rows [t*cpl:(t+1)*cpl] = w[:, :, kh, kw].
    w3cat = [p['w_bottle'][i].transpose(2, 3, 0, 1).reshape(9 * cpl, cpl)
             .astype(cdt) for i in range(L)]

    blobs, btot = {}, {}

    # ---- Stage I (forward pass of the clique) -------------------------------
    for i in range(1, L + 1):
        srcs = [x] + [blobs[j] for j in range(1, i)]
        tots = [x_tot] + [btot[j] for j in range(1, i)]
        blobs[i], btot[i] = _clique_step(
            srcs, tots, p['fbn_g'][i - 1], p['fbn_b'][i - 1], w_cat_I[i],
            p['fbnb_g'][i - 1], p['fbnb_b'][i - 1], w3cat[i - 1], masks,
            cpl, height, width, count, hwt, cdt, vmem_limit)

    # ---- Stage II (loop refinement, blob dict updated in place) -------------
    for _ in range(loops):
        for i in range(1, L + 1):
            others = [j for j in range(1, L + 1) if j != i]
            blobs[i], btot[i] = _clique_step(
                [blobs[j] for j in others], [btot[j] for j in others],
                p['lbn_g'][i - 1], p['lbn_b'][i - 1], w_cat_II[i],
                p['lbnb_g'][i - 1], p['lbnb_b'][i - 1], w3cat[i - 1], masks,
                cpl, height, width, count, hwt, cdt, vmem_limit)

    # NOTE: the PyTorch module appends the SAME blob_dict object to
    # blob_dict_list every time, so block_feature_I also sees the final
    # (post-loop) blobs.  We reproduce that aliasing exactly.
    # TODO(synk): the last stage-II pass could write each blob straight into
    # its channel slice of `feat` (out index_map channel offset) and skip the
    # concatenate copies below.
    feat = jnp.concatenate([blobs[i].astype(jnp.float32)
                            for i in range(1, L + 1)], axis=1)
    feat_I = jnp.concatenate([x, feat], axis=1)
    return (feat_I.reshape(n, in_ch + L * cpl, height, width),
            feat.reshape(n, L * cpl, height, width))


# ----------------------------------------------------------------------------
# Pure-jnp reference (NCHW, mirrors the PyTorch module) for the self-check.
# ----------------------------------------------------------------------------
def _bn_ref(x, g, b):
    m = jnp.mean(x, axis=(0, 2, 3), keepdims=True)
    v = jnp.mean((x - m) ** 2, axis=(0, 2, 3), keepdims=True)
    return ((x - m) * jax.lax.rsqrt(v + EPS) * g.reshape(1, -1, 1, 1)
            + b.reshape(1, -1, 1, 1))


def _clique_block_ref(x, p):
    L, loops = p['layer_num'], p['loop_num']
    hp = jax.lax.Precision.HIGHEST

    def step(srcs, ws, g1, b1, g2, b2, w3):
        bottom = jnp.concatenate(srcs, axis=1)
        wcat = jnp.concatenate(ws, axis=1)          # (cpl, sum C_s)
        h = jnp.maximum(_bn_ref(bottom, g1, b1), 0.0)
        mid = jnp.einsum('oc,nchw->nohw', wcat, h, precision=hp)
        mid = jnp.maximum(_bn_ref(mid, g2, b2), 0.0)
        return jax.lax.conv_general_dilated(
            mid, w3, (1, 1), ((1, 1), (1, 1)),
            dimension_numbers=('NCHW', 'OIHW', 'NCHW'), precision=hp)

    blobs = {}
    for i in range(1, L + 1):
        srcs = [x] + [blobs[j] for j in range(1, i)]
        ws = [p['w_in'][i]] + [p['w_cross'][(j, i)] for j in range(1, i)]
        blobs[i] = step(srcs, ws, p['fbn_g'][i - 1], p['fbn_b'][i - 1],
                        p['fbnb_g'][i - 1], p['fbnb_b'][i - 1],
                        p['w_bottle'][i - 1])
    for _ in range(loops):
        for i in range(1, L + 1):
            others = [j for j in range(1, L + 1) if j != i]
            srcs = [blobs[j] for j in others]
            ws = [p['w_cross'][(j, i)] for j in others]
            blobs[i] = step(srcs, ws, p['lbn_g'][i - 1], p['lbn_b'][i - 1],
                            p['lbnb_g'][i - 1], p['lbnb_b'][i - 1],
                            p['w_bottle'][i - 1])
    feat = jnp.concatenate([blobs[i] for i in range(1, L + 1)], axis=1)
    return jnp.concatenate([x, feat], axis=1), feat


# ----------------------------------------------------------------------------
# Deterministic parameter construction (shapes per the module's __init__)
# ----------------------------------------------------------------------------
def init_params(key, in_ch, cpl, L, loop_num):
    idx = [0]

    def nk():
        idx[0] += 1
        return jax.random.fold_in(key, idx[0])

    def nrm(shape, scale=0.1):
        return scale * jax.random.normal(nk(), shape, jnp.float32)

    p = {'layer_num': L, 'loop_num': loop_num, 'cpl': cpl, 'in_ch': in_ch}
    # conv_param[i], i=1..L : Conv2d(in_ch -> cpl, 1x1)      -> (cpl, in_ch)
    p['w_in'] = {i: nrm((cpl, in_ch)) for i in range(1, L + 1)}
    # conv_param[j*(L+1)+i], j!=i : Conv2d(cpl -> cpl, 1x1)  -> (cpl, cpl)
    p['w_cross'] = {(j, i): nrm((cpl, cpl))
                    for j in range(1, L + 1) for i in range(1, L + 1) if i != j}
    # conv_param_bottle[i] : Conv2d(cpl -> cpl, 3x3, pad=1)  -> OIHW
    p['w_bottle'] = [nrm((cpl, cpl, 3, 3)) for _ in range(L)]
    # BatchNorm affine parameters
    p['fbn_g'] = [1.0 + nrm((in_ch + i * cpl,)) for i in range(L)]
    p['fbn_b'] = [nrm((in_ch + i * cpl,)) for i in range(L)]
    p['fbnb_g'] = [1.0 + nrm((cpl,)) for _ in range(L)]
    p['fbnb_b'] = [nrm((cpl,)) for _ in range(L)]
    p['lbn_g'] = [1.0 + nrm((cpl * (L - 1),)) for _ in range(L)]
    p['lbn_b'] = [nrm((cpl * (L - 1),)) for _ in range(L)]
    p['lbnb_g'] = [1.0 + nrm((cpl,)) for _ in range(L)]
    p['lbnb_b'] = [nrm((cpl,)) for _ in range(L)]
    return p


if __name__ == "__main__":
    key = jax.random.PRNGKey(0)
    N, in_ch, H, W = 2, 8, 16, 16
    cpl, L, loop_num = 8, 3, 2           # keep_prob is unused in forward()

    params = init_params(jax.random.fold_in(key, 1), in_ch, cpl, L, loop_num)
    x = jax.random.normal(jax.random.fold_in(key, 2), (N, in_ch, H, W),
                          jnp.float32)

    ref_I, ref_II = clique_block_forward(x, params, use_pallas=False)
    ref_I, ref_II = np.asarray(ref_I), np.asarray(ref_II)

    # 1) Structural verification: f32 end-to-end through the Pallas kernels
    #    (hw_tile_cap=128 forces a multi-tile spatial grid and exercises the
    #    cross-tile BN-statistics accumulation even at this small demo size).
    f32_I, f32_II = clique_block_forward(x, params, use_pallas=True,
                                         compute_dtype=jnp.float32,
                                         hw_tile_cap=128)
    jax.block_until_ready((f32_I, f32_II))
    np.testing.assert_allclose(np.asarray(f32_I), ref_I, rtol=5e-2, atol=5e-2)
    np.testing.assert_allclose(np.asarray(f32_II), ref_II, rtol=5e-2, atol=5e-2)

    # 2) Performance path: bf16 weights, bf16 blob/mid HBM storage, bf16 MXU
    #    operands (f32 accumulation).  Drift vs. the f32-HIGHEST reference
    #    grows with clique depth (9 BN->conv steps); bound it with a documented
    #    absolute tolerance instead of a tight per-element rtol.
    bf_I, bf_II = clique_block_forward(x, params, use_pallas=True,
                                       compute_dtype=jnp.bfloat16,
                                       hw_tile_cap=128)
    jax.block_until_ready((bf_I, bf_II))
    assert bf_I.shape == (N, in_ch + L * cpl, H, W)
    assert bf_II.shape == (N, L * cpl, H, W)
    for got, want in ((np.asarray(bf_I), ref_I), (np.asarray(bf_II), ref_II)):
        diff = np.abs(got - want)
        max_err, mean_err = float(diff.max()), float(diff.mean())
        assert np.isfinite(got).all()
        assert max_err < 0.4 and mean_err < 0.05, (max_err, mean_err)

    print("KERNEL_OK")
</pallas_src>

<mosaic_0001>
module attributes {stable_mosaic.version = 11 : i64} {
  func.func @kernel(%arg0: i32, %arg1: i32, %arg2: memref<1x8x128xf32, #tpu.memory_space<vmem>>, %arg3: memref<8x1xf32, #tpu.memory_space<vmem>>, %arg4: memref<8x1xf32, #tpu.memory_space<vmem>>, %arg5: memref<8x8xf32, #tpu.memory_space<vmem>>, %arg6: memref<1x8x128xf32, #tpu.memory_space<vmem>>, %arg7: memref<1x8x2xf32, #tpu.memory_space<vmem>>, %arg8: memref<8x1xf32, #tpu.memory_space<vmem>>, %arg9: memref<8x1xf32, #tpu.memory_space<vmem>>) attributes {dimension_semantics = [#tpu.dimension_semantics<parallel>, #tpu.dimension_semantics<arbitrary>], iteration_bounds = array<i64: 2, 2>, scalar_prefetch = 0 : i64, scratch_operands = 2 : i64, tpu.core_type = #tpu.core_type<tc>, window_params = [{transform_indices = @transform_0, window_bounds = array<i64: 1, 8, 128>}, {pipeline_mode = #tpu.pipeline_mode<synchronous>, transform_indices = @transform_1, window_bounds = array<i64: 8, 1>}, {pipeline_mode = #tpu.pipeline_mode<synchronous>, transform_indices = @transform_2, window_bounds = array<i64: 8, 1>}, {pipeline_mode = #tpu.pipeline_mode<synchronous>, transform_indices = @transform_3, window_bounds = array<i64: 8, 8>}, {transform_indices = @transform_4, window_bounds = array<i64: 1, 8, 128>}, {transform_indices = @transform_5, window_bounds = array<i64: 1, 8, 2>}]} {
    %c0 = arith.constant 0 : index
    %c0_0 = arith.constant 0 : index
    %c0_1 = arith.constant 0 : index
    %0 = vector.load %arg2[%c0, %c0_0, %c0_1] : memref<1x8x128xf32, #tpu.memory_space<vmem>>, vector<1x8x128xf32>
    %1 = vector.shape_cast %0 : vector<1x8x128xf32> to vector<8x128xf32>
    %c0_2 = arith.constant 0 : index
    %c0_3 = arith.constant 0 : index
    %2 = vector.load %arg3[%c0_2, %c0_3] : memref<8x1xf32, #tpu.memory_space<vmem>>, vector<8x1xf32>
    %3 = vector.broadcast %2 : vector<8x1xf32> to vector<8x128xf32>
    %4 = arith.mulf %1, %3 : vector<8x128xf32>
    %c0_4 = arith.constant 0 : index
    %c0_5 = arith.constant 0 : index
    %5 = vector.load %arg4[%c0_4, %c0_5] : memref<8x1xf32, #tpu.memory_space<vmem>>, vector<8x1xf32>
    %6 = vector.broadcast %5 : vector<8x1xf32> to vector<8x128xf32>
    %7 = arith.addf %4, %6 : vector<8x128xf32>
    %cst = arith.constant 0.000000e+00 : f32
    %8 = vector.broadcast %cst : f32 to vector<8x128xf32>
    %9 = arith.maximumf %7, %8 : vector<8x128xf32>
    %c0_6 = arith.constant 0 : index
    %c0_7 = arith.constant 0 : index
    %10 = vector.load %arg5[%c0_6, %c0_7] : memref<8x8xf32, #tpu.memory_space<vmem>>, vector<8x8xf32>
    %cst_8 = arith.constant dense<0.000000e+00> : vector<8x128xf32>
    %11 = tpu.matmul %10, %9, %cst_8 {dimension_numbers = #tpu.dot_dimension_numbers<[1], [0], [0], [1], [0, 0, 1, 1], [], []>, precision = #tpu.contract_precision<fp32>} : vector<8x8xf32>, vector<8x128xf32>, vector<8x128xf32> -> vector<8x128xf32>
    %c0_9 = arith.constant 0 : index
    %c0_10 = arith.constant 0 : index
    %c0_11 = arith.constant 0 : index
    %12 = vector.load %arg6[%c0_9, %c0_10, %c0_11] : memref<1x8x128xf32, #tpu.memory_space<vmem>>, vector<1x8x128xf32>
    %13 = vector.shape_cast %12 : vector<1x8x128xf32> to vector<8x128xf32>
    %14 = vector.shape_cast %11 : vector<8x128xf32> to vector<1x8x128xf32>
    tpu.vector_store %arg6[%c0_9, %c0_10, %c0_11], %14 {strides = array<i32>} : memref<1x8x128xf32, #tpu.memory_space<vmem>>, vector<1x8x128xf32>,
    %cst_12 = arith.constant dense<0.000000e+00> : vector<8xf32>
    %15 = vector.multi_reduction <add>, %11, %cst_12 [1] : vector<8x128xf32> to vector<8xf32>
    %16 = vector.shape_cast %15 : vector<8xf32> to vector<8x1xf32>
    %17 = arith.mulf %11, %11 : vector<8x128xf32>
    %cst_13 = arith.constant dense<0.000000e+00> : vector<8xf32>
    %18 = vector.multi_reduction <add>, %17, %cst_13 [1] : vector<8x128xf32> to vector<8xf32>
    %19 = vector.shape_cast %18 : vector<8xf32> to vector<8x1xf32>
    %c0_i32 = arith.constant 0 : i32
    %20 = arith.cmpi eq, %arg1, %c0_i32 : i32
    %21 = arith.extui %20 : i1 to i32
    %c0_i32_14 = arith.constant 0 : i32
    %22 = arith.cmpi ne, %21, %c0_i32_14 : i32
    scf.if %22 {
      %cst_24 = arith.constant 0.000000e+00 : f32
      %32 = vector.broadcast %cst_24 : f32 to vector<8x1xf32>
      %c0_25 = arith.constant 0 : index
      %c0_26 = arith.constant 0 : index
      %33 = vector.load %arg8[%c0_25, %c0_26] : memref<8x1xf32, #tpu.memory_space<vmem>>, vector<8x1xf32>
      tpu.vector_store %arg8[%c0_25, %c0_26], %32 {strides = array<i32>} : memref<8x1xf32, #tpu.memory_space<vmem>>, vector<8x1xf32>,
      %cst_27 = arith.constant 0.000000e+00 : f32
      %34 = vector.broadcast %cst_27 : f32 to vector<8x1xf32>
      %c0_28 = arith.constant 0 : index
      %c0_29 = arith.constant 0 : index
      %35 = vector.load %arg9[%c0_28, %c0_29] : memref<8x1xf32, #tpu.memory_space<vmem>>, vector<8x1xf32>
      tpu.vector_store %arg9[%c0_28, %c0_29], %34 {strides = array<i32>} : memref<8x1xf32, #tpu.memory_space<vmem>>, vector<8x1xf32>,
    } else {
    }
    %c0_15 = arith.constant 0 : index
    %c0_16 = arith.constant 0 : index
    %23 = vector.load %arg8[%c0_15, %c0_16] : memref<8x1xf32, #tpu.memory_space<vmem>>, vector<8x1xf32>
    %24 = arith.addf %23, %16 : vector<8x1xf32>
    %c0_17 = arith.constant 0 : index
    %c0_18 = arith.constant 0 : index
    %25 = vector.load %arg8[%c0_17, %c0_18] : memref<8x1xf32, #tpu.memory_space<vmem>>, vector<8x1xf32>
    tpu.vector_store %arg8[%c0_17, %c0_18], %24 {strides = array<i32>} : memref<8x1xf32, #tpu.memory_space<vmem>>, vector<8x1xf32>,
    %c0_19 = arith.constant 0 : index
    %c0_20 = arith.constant 0 : index
    %26 = vector.load %arg9[%c0_19, %c0_20] : memref<8x1xf32, #tpu.memory_space<vmem>>, vector<8x1xf32>
    %27 = arith.addf %26, %19 : vector<8x1xf32>
    %c0_21 = arith.constant 0 : index
    %c0_22 = arith.constant 0 : index
    %28 = vector.load %arg9[%c0_21, %c0_22] : memref<8x1xf32, #tpu.memory_space<vmem>>, vector<8x1xf32>
    tpu.vector_store %arg9[%c0_21, %c0_22], %27 {strides = array<i32>} : memref<8x1xf32, #tpu.memory_space<vmem>>, vector<8x1xf32>,
    %c1_i32 = arith.constant 1 : i32
    %29 = arith.cmpi eq, %arg1, %c1_i32 : i32
    %30 = arith.extui %29 : i1 to i32
    %c0_i32_23 = arith.constant 0 : i32
    %31 = arith.cmpi ne, %30, %c0_i32_23 : i32
    scf.if %31 {
      %c0_24 = arith.constant 0 : index
      %c0_25 = arith.constant 0 : index
      %32 = vector.load %arg8[%c0_24, %c0_25] : memref<8x1xf32, #tpu.memory_space<vmem>>, vector<8x1xf32>
      %c0_26 = arith.constant 0 : index
      %c0_27 = arith.constant 0 : index
      %c0_28 = arith.constant 0 : index
      %33 = vector.load %arg7[%c0_26, %c0_27, %c0_28] : memref<1x8x2xf32, #tpu.memory_space<vmem>>, vector<1x8x1xf32>
      %34 = vector.shape_cast %33 : vector<1x8x1xf32> to vector<8x1xf32>
      %35 = vector.shape_cast %32 : vector<8x1xf32> to vector<1x8x1xf32>
      tpu.vector_store %arg7[%c0_26, %c0_27, %c0_28], %35 {strides = array<i32>} : memref<1x8x2xf32, #tpu.memory_space<vmem>>, vector<1x8x1xf32>,
      %c0_29 = arith.constant 0 : index
      %c0_30 = arith.constant 0 : index
      %36 = vector.load %arg9[%c0_29, %c0_30] : memref<8x1xf32, #tpu.memory_space<vmem>>, vector<8x1xf32>
      %c0_31 = arith.constant 0 : index
      %c0_32 = arith.constant 0 : index
      %c1 = arith.constant 1 : index
      %37 = vector.load %arg7[%c0_31, %c0_32, %c1] : memref<1x8x2xf32, #tpu.memory_space<vmem>>, vector<1x8x1xf32>
      %38 = vector.shape_cast %37 : vector<1x8x1xf32> to vector<8x1xf32>
      %39 = vector.shape_cast %36 : vector<8x1xf32> to vector<1x8x1xf32>
      tpu.vector_store %arg7[%c0_31, %c0_32, %c1], %39 {strides = array<i32>} : memref<1x8x2xf32, #tpu.memory_space<vmem>>, vector<1x8x1xf32>,
    } else {
    }
    return
  }
  func.func @transform_0(%arg0: i32, %arg1: i32) -> (i32, i32, i32) {
    %c0_i32 = arith.constant 0 : i32
    %c0_i32_0 = arith.constant 0 : i32
    return %arg0, %c0_i32, %arg1 : i32, i32, i32
  }
  func.func @transform_1(%arg0: i32, %arg1: i32) -> (i32, i32) {
    %c0_i32 = arith.constant 0 : i32
    %c0_i32_0 = arith.constant 0 : i32
    %c0_i32_1 = arith.constant 0 : i32
    return %c0_i32, %c0_i32_0 : i32, i32
  }
  func.func @transform_2(%arg0: i32, %arg1: i32) -> (i32, i32) {
    %c0_i32 = arith.constant 0 : i32
    %c0_i32_0 = arith.constant 0 : i32
    %c0_i32_1 = arith.constant 0 : i32
    return %c0_i32, %c0_i32_0 : i32, i32
  }
  func.func @transform_3(%arg0: i32, %arg1: i32) -> (i32, i32) {
    %c0_i32 = arith.constant 0 : i32
    %c0_i32_0 = arith.constant 0 : i32
    %c0_i32_1 = arith.constant 0 : i32
    return %c0_i32, %c0_i32_0 : i32, i32
  }
  func.func @transform_4(%arg0: i32, %arg1: i32) -> (i32, i32, i32) {
    %c0_i32 = arith.constant 0 : i32
    %c0_i32_0 = arith.constant 0 : i32
    return %arg0, %c0_i32, %arg1 : i32, i32, i32
  }
  func.func @transform_5(%arg0: i32, %arg1: i32) -> (i32, i32, i32) {
    %c0_i32 = arith.constant 0 : i32
    %c0_i32_0 = arith.constant 0 : i32
    %c0_i32_1 = arith.constant 0 : i32
    return %arg0, %c0_i32, %c0_i32_0 : i32, i32, i32
  }
}

</mosaic_0001>

<bundles_post_ra>
// kernel: tpu_custom_call.1
= control target key start
LH: loop header
LB: loop body
LE: loop exit
PB: predicated region body
PF: predicated region fallthrough
CT: control target
= control target key end

     0   :  { %11 = vsyncpa [#allocation5], 0  ;;  %s1038_s0 = inlined_call_operand.hbm [shape: f32[2,8,256], index: 0, kind: input, shape index: {}]   ;;  %s1039_s1 = inlined_call_operand.vmem [shape: f32[8,1], index: 1, kind: input, shape index: {}]   ;;  %s1040_s2 = inlined_call_operand.vmem [shape: f32[8,1], index: 2, kind: input, shape index: {}]   ;;  %s1041_s3 = inlined_call_operand.vmem [shape: f32[8,8], index: 3, kind: input, shape index: {}]   ;;  %s1042_s4 = inlined_call_operand.hbm [shape: f32[2,8,256], index: 4, kind: output, shape index: {0}]   ;;  %s1043_s5 = inlined_call_operand.vmem [shape: f32[2,8,2], index: 5, kind: output, shape index: {1}]  }
   0x1   :  { %13 = vsyncpa [#allocation5 + $0x1], 0 }
   0x2   :  { %14 = vsyncpa [#allocation6], 0 }
   0x3   :  { %16 = vsyncpa [#allocation6 + $0x1], 0  ;;  %s868_s18 = smov 0   ;;  %s870_s19 = smov 0  }
   0x4   :  { %s872_s20 = smov 0   ;;  %s874_s21 = smov 0  }
   0x5   :  { %s876_s22 = smov 0   ;;  %s878_s23 = smov 0  }
   0x6   :  { %s880_s24 = smov 0   ;;  %s882_s25 = smov 0  }
   0x7 LB: > { %s605_s26 = sadd.s32 4294967295, %s833_s25   ;;  %s606_s27 = sadd.s32 4294967294, %s833_s25   ;;  %s833_s25 = sphi %s882_s25, %s22_s25   ;;  %s829_s24 = sphi %s880_s24, %s1063_s24   ;;  %s825_s23 = sphi %s878_s23, %s1062_s23   ;;  %s821_s22 = sphi %s876_s22, %s1061_s22   ;;  %s817_s21 = sphi %s874_s21, %s1060_s21   ;;  %s813_s20 = sphi %s872_s20, %s1059_s20   ;;  %s809_s19 = sphi %s870_s19, %s1058_s19   ;;  %s805_s18 = sphi %s868_s18, %s1057_s18  }
   0x8   : > { %s31_s28 = sadd.s32 1, %s825_s23  ;;  %s34_s29 = sadd.s32 1, %s829_s24 }
   0x9   : > { %p32_p0 = scmp.ge.s32.totalorder %s31_s28, 2  ;;  %s43_s30 = sadd.s32 1, %s813_s20 }
   0xa   : > { %p50_p1 = scmp.ne.s32.totalorder %s813_s20, %s809_s19  ;;  %p51_p2 = scmp.eq.s32.totalorder %s833_s25, 0 }
   0xb   : > { %s1065_s28 = smov (%p32_p0, %s31_s28), 0  ;;  %s1067_s29 = smov (!%p32_p0, %s34_s29), %s829_s24 }
   0xc   : > { %1047 = sst [smem:[#allocation10_spill]] %s1065_s28  ;;  %s39_s6 = ssub.s32 %s825_s23, %s1065_s28 }
   0xd   : > { %p921_p3 = por %p51_p2, %p50_p1  ;;  %p36_p4 = scmp.ge.s32.totalorder %s1067_s29, 2 }
   0xe   : > { %p56_p5 = scmp.ne.s32.totalorder %s809_s19, %s805_s18  ;;  %p57_p6 = scmp.eq.s32.totalorder %s605_s26, 0 }
   0xf   : > { %p145_p7 = scmp.eq.s32.totalorder %s605_s26, 3  ;;  %s1069_s29 = smov (%p36_p4, %s1067_s29), 0 }
  0x10   : > { %1049 = sst [smem:[#allocation11_spill]] %s1069_s29  ;;  %p929_p8 = por %p57_p6, %p56_p5 }
  0x11   : > { %p933_p9 = por %p145_p7, %p50_p1  ;;  %s38_s10 = ssub.s32 %s829_s24, %s1069_s29 }
  0x12   : > { %p151_p10 = scmp.eq.s32.totalorder %s606_s27, 3  ;;  %s40_s11 = sor.u32 %s39_s6, %s38_s10 }
  0x13   : > { %p41_p11 = scmp.eq.s32.totalorder %s40_s11, 0  ;;  %p635_p13 = scmp.lt.s32.totalorder %s833_s25, 4 }
  0x14   : > { %p939_p12 = por %p151_p10, %p56_p5  ;;  %s206_s13 = sand.u32 1, %s813_s20  }
  0x15   : > { %s946_s14 = scalar_select %p41_p11, %s813_s20, %s43_s30  }
  0x16   : > { %s1052_s12 = scalar_select %p939_p12, 1, 0 }
  0x17   : > { %s609_s15 = sshll.u32 %s206_s13, 3  ;;  %s610_s16 = sshll.u32 %s829_s24, 1 }
  0x18   : > { %1053 = sst [smem:[#allocation12_spill]] %s1052_s12  ;;  %s214_s17 = sadd.s32 %s825_s23, %s610_s16 }
  0x19   : > { %s210_s26 = scalar_lea.vmem [#allocation4], %s609_s15  ;;  %s611_s29 = sshll.u32 %s214_s17, 3 }
  0x1a   : > { %s220_s28 = sshll.u32 %s210_s26, 4  ;;  %s216_s10 = scalar_lea.hbm %s1038_s0, %s611_s29  ;;  %s221_s28 = int_to_ptr.vmem [resolvable:$true] %s220_s28 }
  0x1b   : > { %p628_p0 = pnand %p635_p13, %p921_p3  ;;  %s218_s11 = sshll.u32 %s216_s10, 4  ;;  %s219_s11 = int_to_ptr.hbm [resolvable:$true] %s218_s11 }
  0x1c   : > { %p612_p1 = scmp.ge.s32.totalorder %s833_s25, 1  ;;  %s207_s12 = scalar_lea.sflag [#allocation5], %s206_s13 }
  0x1d   : > { %630 = dma.hbm_to_vmem [thread:$0]  (!%p628_p0), %s219_s11, 128, %s221_s28, %s207_s12  }
  0x1e   : > { %p225_p2 = scmp.lt.s32.totalorder %s833_s25, 5 }
  0x20   : > { %p226_p4 = pnand %p612_p1, %p225_p2 }
  0x21   : > { %s958_s30 = sand.u32 (!%p226_p4), 1, %s809_s19  }
  0x22   : > { %229 = sbr.rel (%p226_p4) target bundleno = 593 (0x251), region = 36  ;;  %s613_s15 = sshll.u32 (!%p226_p4), %s958_s30, 3 }
  0x23   : > { %s232_s16 = scalar_lea.sflag (!%p226_p4), [#allocation5], %s958_s30  ;;  %s235_s29 = scalar_lea.vmem (!%p226_p4), [#allocation4], %s613_s15 }
  0x27   : > { %796 = dma.done.wait (%p929_p8), %s232_s16, 128  }
  0x28   : > { %798 = vsyncadd (%p929_p8), %s232_s16, 4294967168  ;;  %v835_v0 = vmov 0   ;;  %v272_v1 = vld [vmem:[%s1039_s1] sm:$0xff]  ;;  %p267_p3 = scmp.lt.s32.totalorder %s821_s22, 1  ;;  %vm288_vm0 = vcmask 64512   ;;  %v271_v8 = vld [vmem:[%s235_s29] sm:$0xff] }
  0x29   : > { %704 = vset.pattern.permute.xlu0 %v835_v0  ;;  %v279_v2 = vld [vmem:[%s1040_s2] sm:$0xff]  ;;  %s986_s16 = scalar_lea.vmem [#allocation7], %s613_s15  ;;  %p616_p5 = scmp.ne.s32.totalorder %s817_s21, 0 }
  0x2a   : > { %275 = vperm.xlu0 %704, %v272_v1   ;;  %s268_s12 = scalar_select %p267_p3, %s821_s22, 1  ;;  %v287_v3 = vld [vmem:[%s1041_s3] sm:$0xff] }
  0x2b   : > { %v290_v4 = vsel %vm288_vm0, %v287_v3, 0 }
  0x2c   : > { %s615_s26 = sshll.u32 %s268_s12, 3  ;;  %v309_v5 = vand.u32 4294901760, %v290_v4 }
  0x2d   : > { %s979_s8 = scalar_lea.vmem %s1043_s5, %s615_s26 }
  0x2e   : > { %v310_v7 = vsub.f32 %v290_v4, %v309_v5 }
  0x30   : > { %v311_v9 = vand.u32 4294901760, %v310_v7 }
  0x32   : > { %282 = vperm.xlu0 %704, %v279_v2   ;;  %v312_v12 = vsub.f32 %v310_v7, %v311_v9 }
  0x34   : > { %v313_v15 = vand.u32 4294901760, %v312_v12 }
  0x9c   : > { %v276_v6 = vpop.permute.xlu0 %275 }
  0x9d   : > { %v278_v10 = vmul.f32 %v276_v6, %v271_v8 }
  0xa4   : > { %v283_v11 = vpop.permute.xlu0 %282 }
  0xa5   : > { %v285_v13 = vadd.f32 %v283_v11, %v278_v10 }
  0xa7   : > { %v286_v14 = vmax.f32 %v285_v13, 0.0 }
  0xa9   : > { %v307_v16 = vand.u32 4294901760, %v286_v14 }
  0xab   : > { %v334_v17 = vsub.f32 %v286_v14, %v307_v16  ;;  %308 = vmatpush.msra.mxu0 %v307_v16  ;;  %384 = vmatpush.msra.mxu3 %v307_v16 }
  0xac   : > { %314 = vmatmul.f32.vlgmr.msra.gmra.mxu0 %v313_v15  ;;  %388 = vmatmul.f32.vlgmr.msra.gmra.mxu3 %v311_v9 }
  0xad   : > { %361 = vmatpush.msra.mxu2 %v334_v17  ;;  %v335_v18 = vand.u32 4294901760, %v334_v17 }
  0xae   : > { %364 = vmatmul.f32.vlgmr.msra.gmra.mxu2 %v310_v7 }
  0xaf   : > { %410 = vmatpush.msrb.mxu0 %v335_v18  ;;  %v336_v19 = vsub.f32 %v334_v17, %v335_v18 }
  0xb1   : > { %v337_v20 = vand.u32 4294901760, %v336_v19 }
  0xb3   : > { %338 = vmatpush.msra.mxu1 %v337_v20 }
  0xb4   : > { %340 = vmatmul.f32.vlgmr.msra.gmra.mxu1 %v309_v5  ;;  %412 = vmatmul.f32.vlgmr.msrb.gmra.mxu0 %v309_v5 }
  0xb5   : > { %432 = vmatpush.msrb.mxu1 %v307_v16 }
  0xbc   : > { %434 = vmatmul.f32.vlgmr.msrb.gmra.mxu1 %v309_v5 }
 0x129   : > { %v315_v21 = vpop.f32.mrf.mxu0 }
 0x12f   : > { %v389_v25 = vpop.f32.mrf.mxu3 }
 0x131   : > { %v341_v22 = vpop.f32.mrf.mxu1  ;;  %v365_v23 = vpop.f32.mrf.mxu2 }
 0x132   : > { %v342_v24 = vadd.f32 %v341_v22, %v315_v21  ;;  %v413_v27 = vpop.f32.mrf.mxu0 }
 0x134   : > { %v366_v26 = vadd.f32 %v365_v23, %v342_v24 }
 0x136   : > { %v390_v28 = vadd.f32 %v389_v25, %v366_v26 }
 0x138   : > { %v414_v29 = vadd.f32 %v413_v27, %v390_v28 }
 0x139   : > { %v435_v30 = vpop.f32.mrf.mxu1 }
 0x13a   : > { %v436_v31 = vadd.f32 %v435_v30, %v414_v29 }
 0x13c   : > { %438 = vst [vmem:[%s986_s16] sm:$0xff] %v436_v31  ;;  %439 = vadd.xlane.f32.xlu1 %v436_v31  ;;  %v441_v32 = vmul.f32 %v436_v31, %v436_v31 }
 0x144   : > { %442 = vadd.xlane.f32.xlu1 %v441_v32 }
 0x1af   : > { %v440_v33 = vpop.xlane.xlu1 %439 }
 0x1b3   : > { %447 = sbr.rel (%p616_p5) target bundleno = 443 (0x1bb), region = 44 }
 0x1b7   : > { %v443_v34 = vpop.xlane.xlu1 %442 }
 0x1b8   : > { %vm448_vm1 = vcmask 7168   ;;  %v836_v35 = vmov 0.0  }
 0x1b9   : > { %449 = vst.msk [vmem:[#allocation2] sm:$0xff] %vm448_vm1, %v836_v35 }
 0x1ba   : > { %450 = vst.msk [vmem:[#allocation3] sm:$0xff] %vm448_vm1, %v836_v35 }
 0x1bb PF: > { %vm453_vm2 = vcmask 7168   ;;  %p617_p6 = scmp.ne.s32.totalorder %s817_s21, 1 }
 0x1bc   : > { %s837_s15 = smov (!%p617_p6), 1  }
 0x1c0   : > { %v451_v36 = vld [vmem:[#allocation2] sm:$0xff]  ;;  %461 = sbr.rel (%p617_p6) target bundleno = 576 (0x240), region = 48 }
 0x1c1   : > { %v455_v37 = vld [vmem:[#allocation3] sm:$0xff]  ;;  %v452_v38 = vadd.f32 %v451_v36, %v440_v33 }
 0x1c2   : > { %v456_v39 = vadd.f32 %v455_v37, %v443_v34 }
 0x1c3   : > { %454 = vst.msk [vmem:[#allocation2] sm:$0xff] %vm453_vm2, %v452_v38 }
 0x1c4   : > { %457 = vst.msk [vmem:[#allocation3] sm:$0xff] %vm453_vm2, %v456_v39 }
 0x1c5   : > { %vm469_vm3 = vcmask 15368  }
 0x1ca   : > { %v462_v41 = vld [vmem:[#allocation2] sm:$0xff] }
 0x1cb   : > { %v464_v40 = vld [vmem:[#allocation3] sm:$0xff]  ;;  %463 = vst.msk [vmem:[%s979_s8] sm:$0xff] %vm453_vm2, %v462_v41 }
 0x1cc   : > { %466 = vrot.lane.b32.xlu0 %v464_v40, %s837_s15 }
 0x23e   : > { %v467_v42 = vpop.permute.xlu0 %466 }
 0x23f   : > { %470 = vst.msk [vmem:[%s979_s8] sm:$0xff] %vm469_vm3, %v467_v42 }
 0x240 PF: > { %s619_s29 = sshll.u32 %s821_s22, 1  ;;  %s490_s7 = sshll.u32 %s986_s16, 4  ;;  %s491_s7 = int_to_ptr.vmem [resolvable:$true] %s490_s7 }
 0x241   : > { %s486_s28 = sadd.s32 %s817_s21, %s619_s29  ;;  %s472_s6 = scalar_lea.sflag [#allocation6], %s958_s30 }
 0x242   : > { %s620_s12 = sshll.u32 %s486_s28, 3  ;;  %s755_s21 = scalar_lea.hbm %s1042_s4, 32 }
 0x243   : > { %s488_s26 = scalar_lea.hbm %s1042_s4, %s620_s12 }
 0x244   : > { %s492_s27 = sshll.u32 %s488_s26, 4  ;;  %s493_s27 = int_to_ptr.hbm [resolvable:$true] %s492_s27 }
 0x245   : > { %s749_s10 = sshra.s32 %s493_s27, 4  ;;  %s750_s10 = int_to_ptr.hbm [resolvable:$true] %s749_s10 }
 0x246   : > { %s751_s8 = scalar_lea.hbm %s750_s10, 8  ;;  %p756_p11 = scmp.lt.s32.totalorder %s750_s10, %s1042_s4 }
 0x247   : > { %p752_p7 = scmp.ne.s32.totalorder %s750_s10, %s751_s8  ;;  %p757_p13 = scmp.lt.s32.totalorder %s755_s21, %s751_s8 }
 0x249   : > { %p753_p8 = pnand %p752_p7, %p933_p9  ;;  %p758_p0 = por %p757_p13, %p756_p11 }
 0x24b   : > { %p754_p10 = pneg %p753_p8 }
 0x24d   : > { %p759_p1 = pnand %p758_p0, %p754_p10 }
 0x24f   : > { %762 = shalt.err (!%p759_p1)
}
 0x250   : > { %625 = dma.vmem_to_hbm [thread:$0]  (%p933_p9), %s491_s7, 128, %s493_s27, %s472_s6  }
 0x251 PF: > { %p636_p2 = scmp.ge.s32.totalorder %s833_s25, 2  ;;  %s507_s29 = sand.u32 1, %s805_s18  }
 0x252   : > { %s508_s28 = scalar_lea.sflag [#allocation6], %s507_s29 }
 0x253   : > { %p632_p4 = pnand %p636_p2, %p939_p12 }
 0x255   : > { %p633_p3 = pneg %p632_p4 }
 0x257   : > { %800 = dma.done.wait (%p633_p3), %s508_s28, 128  }
 0x258   : > { %802 = vsyncadd (%p633_p3), %s508_s28, 4294967168  ;;  %s22_s25 = sadd.s32 1, %s833_s25   ;;  %s1055_s9 = sld [smem:[#allocation10_spill]] }
 0x259   : > { %p19_p5 = scmp.ge.s32.totalorder %s22_s25, 6   ;;  %s1056_s7 = sld [smem:[#allocation11_spill]] }
 0x25a   : > { %s1057_s18 = smov %s809_s19  ;;  %s1058_s19 = smov %s813_s20 }
 0x25b   : > { %s1059_s20 = smov %s946_s14  ;;  %s1060_s21 = smov %s825_s23 }
 0x25c   : > { %s1061_s22 = smov %s829_s24  ;;  %21 = sbr.rel (!%p19_p5) target bundleno = 7 (0x7), region = 101 }
 0x25e   : > { %s1062_s23 = smov %s1055_s9 }
 0x25f   : > { %s1063_s24 = smov %s1056_s7 }
 0x261   :  { %521 = vsyncpa [#allocation5], 1 }
 0x262   :  { %523 = vsyncpa [#allocation5 + $0x1], 1 }
 0x263   :  { %524 = vsyncpa [#allocation6], 1 }
 0x264   :  { %526 = vsyncpa [#allocation6 + $0x1], 1 }

</bundles_post_ra>
